<compile_context>
chip_gen: v6e
topology: v6e:2x2x1
jax: 0.10.0
libtpu: 0.0.40
codegen_flags: <defaults>
</compile_context>

<pallas_src>
import functools

import jax
import jax.numpy as jnp
from jax.experimental import pallas as pl
from jax.experimental.pallas import tpu as pltpu


def _round_up(x, m):
    return ((x + m - 1) // m) * m


def _embed_kernel(idx_ref, expand_ref, lane_id_ref, table_ref, o_ref):
    """out_tile = onehot(idx_tile) @ table  (gather + conv + mean + concat fused,
    P tokens packed per lane-dense output row)."""
    # (tile_rows, P*(1+L)) int32 ids -> f32 (small vocab ids, exact in f32).
    idx_f = idx_ref[...].astype(jnp.float32)
    # Copy each packed id across its vocab segment of the lane axis
    # (tiny K = P*(1+L) matmul).
    idx_exp = jnp.dot(idx_f, expand_ref[...],
                      preferred_element_type=jnp.float32)       # (tile_rows, P*K_pad)
    # One-hot: a lane fires iff its vocab id equals the id owning that segment
    # (padding lanes carry id -1 and never fire).  Compare in f32 (v5e has no
    # bf16 VALU); the exact 0/1 result is cast to the bf16 table dtype for MXU.
    onehot = (idx_exp == lane_id_ref[...]).astype(table_ref.dtype)
    # Single MXU contraction yields the already-concatenated
    # [word | mean-pooled conv] halves for P tokens per 128-lane row.
    out = jnp.dot(onehot, table_ref[...],
                  preferred_element_type=jnp.float32)           # (tile_rows, P*Dout)
    o_ref[...] = out.astype(o_ref.dtype)                        # unmasked full-tile store


def prepare_embedding_constants(word_table, letter_table, conv_w, conv_b,
                                num_letters, *, table_dtype=jnp.bfloat16,
                                lane_target=128):
    """One-time (per-weight) host-side folding of conv+mean+bias into lookup
    tables, plus P-token block-diagonal packing for 128-lane output rows.

    Returns (table, expand, lane_id) ready to pass to embedding_forward.
    """
    Vw, Dw2 = word_table.shape
    Vl, De = letter_table.shape
    k = conv_w.shape[-1]
    L = num_letters
    T = L - k + 1                        # number of valid conv positions
    assert T > 0, "letter sequence length must be >= kernel_size (valid conv)"
    assert max(Vw, Vl) < (1 << 24), "f32 id/compare trick requires vocab < 2^24"

    Dout = 2 * Dw2
    P = max(1, lane_target // Dout)      # tokens packed per output row (=2 here)
    K_tot = Vw + L * Vl
    K_pad = _round_up(K_tot, 128)        # lane/MXU-aligned contraction dim

    # Effective per-letter-position weight of mean(Conv1d(.)):
    #   W_eff[l, d, o] = (1/T) * sum_{j : 0 <= l - j < T} conv_w[o, d, j]
    w_kdo = jnp.transpose(conv_w, (2, 1, 0)).astype(jnp.float32)   # (k, De, Dw2)
    w_eff = jnp.zeros((L, De, Dw2), jnp.float32)
    for j in range(k):
        w_eff = w_eff.at[j:j + T].add(w_kdo[j])
    w_eff = w_eff / T

    # Per-position letter tables with conv + mean + bias pre-applied
    # (bias split as b/L: exactly L letter lanes fire per token).
    m_letters = (jnp.einsum('vd,ldo->lvo', letter_table.astype(jnp.float32), w_eff)
                 + conv_b.astype(jnp.float32)[None, None, :] / L)   # (L, Vl, Dw2)

    # Single-token fused table: [word half | pooled-conv half]; pad rows zero.
    table1 = jnp.zeros((K_pad, Dout), jnp.float32)
    table1 = table1.at[:Vw, :Dw2].set(word_table.astype(jnp.float32))
    table1 = table1.at[Vw:K_tot, Dw2:].set(m_letters.reshape(L * Vl, Dw2))

    # Single-token expansion matrix (copies id c across its vocab segment) and
    # per-lane vocab-id vector (-1 in padding -> never fires).
    C = 1 + L
    expand1 = jnp.zeros((C, K_pad), jnp.float32)
    expand1 = expand1.at[0, :Vw].set(1.0)
    for l in range(L):
        expand1 = expand1.at[1 + l, Vw + l * Vl: Vw + (l + 1) * Vl].set(1.0)
    lane1 = jnp.full((K_pad,), -1.0, jnp.float32)
    lane1 = lane1.at[:K_tot].set(
        jnp.concatenate([jnp.arange(Vw, dtype=jnp.float32),
                         jnp.tile(jnp.arange(Vl, dtype=jnp.float32), L)]))

    # Block-diagonal P-token packing -> 128-lane output rows, full MXU width,
    # unmasked stores.  Zero in-kernel shuffles; unpack is a free reshape.
    expand_blk = jnp.zeros((P * C, P * K_pad), jnp.float32)
    table_blk = jnp.zeros((P * K_pad, P * Dout), jnp.float32)
    for p in range(P):
        expand_blk = expand_blk.at[p * C:(p + 1) * C,
                                   p * K_pad:(p + 1) * K_pad].set(expand1)
        table_blk = table_blk.at[p * K_pad:(p + 1) * K_pad,
                                 p * Dout:(p + 1) * Dout].set(table1)
    lane_blk = jnp.tile(lane1, P)[None, :]                          # (1, P*K_pad)

    return (table_blk.astype(table_dtype), expand_blk, lane_blk)


def embedding_forward(input_w, input_l, table, expand, lane_id, *,
                      tile_rows=1024, out_dtype=jnp.float32):
    """Forward pass of the `Embedding` module (eval mode).

    input_w: (B, S) int32 word ids, input_l: (B, S, L) int32 letter ids.
    table/expand/lane_id: from prepare_embedding_constants (weight-dependent).
    """
    B, S = input_w.shape
    L = input_l.shape[-1]
    C = 1 + L
    # Geometry derived from the prepared constants' shapes (jit-friendly).
    P = expand.shape[0] // C              # tokens packed per output row
    Kp_p = expand.shape[1]                # P * K_pad
    Dout_p = table.shape[1]               # P * Dout (lane-dense, >= 128)
    Dout = Dout_p // P
    N = B * S

    # Per-token index row: [word_id, letter_id_0, ..., letter_id_{L-1}].
    idx_all = jnp.concatenate(
        [input_w.reshape(N, 1), input_l.reshape(N, L)], axis=1).astype(jnp.int32)

    # Pack P consecutive tokens per row (row-major; pad tokens use id 0 ->
    # valid lookups whose results are discarded below).
    n_tok = _round_up(N, P)
    if n_tok != N:
        idx_all = jnp.pad(idx_all, ((0, n_tok - N), (0, 0)))
    n_rows = n_tok // P
    idx_packed = idx_all.reshape(n_rows, P * C)

    # Tile choice: big tiles amortize the ~0.35us/grid-step overhead; clamp so
    # the grid keeps >= 2 steps when possible (v7x megacore) and stays 8-aligned.
    half_rows = _round_up(pl.cdiv(n_rows, 2), 8)
    tile = _round_up(min(tile_rows, max(half_rows, 8)), 8)
    rows_pad = pl.cdiv(n_rows, tile) * tile
    if rows_pad != n_rows:
        idx_packed = jnp.pad(idx_packed, ((0, rows_pad - n_rows), (0, 0)))
    grid = (rows_pad // tile,)

    out = pl.pallas_call(
        _embed_kernel,
        out_shape=jax.ShapeDtypeStruct((rows_pad, Dout_p), out_dtype),
        grid_spec=pltpu.PrefetchScalarGridSpec(
            num_scalar_prefetch=0,
            grid=grid,
            in_specs=[
                pl.BlockSpec((tile, P * C), lambda i: (i, 0)),     # streamed ids
                pl.BlockSpec((P * C, Kp_p), lambda i: (0, 0)),     # VMEM-resident
                pl.BlockSpec((1, Kp_p), lambda i: (0, 0)),         # VMEM-resident
                pl.BlockSpec((Kp_p, Dout_p), lambda i: (0, 0)),    # VMEM-resident
            ],
            out_specs=pl.BlockSpec((tile, Dout_p), lambda i: (i, 0)),
        ),
        compiler_params=pltpu.CompilerParams(
            dimension_semantics=("parallel",),   # shard token tiles over TCs
            vmem_limit_bytes=32 << 20),
    )(idx_packed, expand, lane_id, table)

    # Unpack: (rows, P*Dout) -> (rows*P, Dout) is row-major identical (free).
    out = out.reshape(rows_pad * P, Dout)[:N]
    return out.reshape(B, S, Dout)


if __name__ == "__main__":
    # Module hyper-parameters (small, consistent with the forward pass).
    word_vocab_num = 50
    letter_vocab_num = 30
    word_embedding_dim = 64      # Dw -> word half / conv out channels = 32
    letter_embedding_dim = 16    # De
    kernel_size = 3
    B, S, L = 2, 8, 8

    Dw2 = word_embedding_dim // 2

    key = jax.random.PRNGKey(0)
    k1, k2, k3, k4, k5, k6 = jax.random.split(key, 6)

    # Deterministic synthetic parameters (same shapes as the nn.Module).
    word_table = jax.random.normal(k1, (word_vocab_num, Dw2), jnp.float32) * 0.1
    letter_table = jax.random.normal(
        k2, (letter_vocab_num, letter_embedding_dim), jnp.float32) * 0.1
    conv_w = jax.random.normal(
        k3, (Dw2, letter_embedding_dim, kernel_size), jnp.float32) * 0.1
    conv_b = jax.random.normal(k4, (Dw2,), jnp.float32) * 0.1

    # Deterministic inputs.
    input_w = jax.random.randint(k5, (B, S), 0, word_vocab_num, jnp.int32)
    input_l = jax.random.randint(k6, (B, S, L), 0, letter_vocab_num, jnp.int32)

    # One-time (per-weight) constant preparation, hoisted out of the forward.
    table, expand, lane_id = prepare_embedding_constants(
        word_table, letter_table, conv_w, conv_b, L)
    table, expand, lane_id = jax.block_until_ready((table, expand, lane_id))

    fwd = jax.jit(functools.partial(embedding_forward, tile_rows=1024))
    out = fwd(input_w, input_l, table, expand, lane_id)
    out = jax.block_until_ready(out)
    assert out.shape == (B, S, word_embedding_dim)

    # Pure-JAX f32 reference (gather -> full conv -> mean -> concat).
    N = B * S
    emb_w_ref = jnp.take(word_table, input_w.reshape(N), axis=0)
    emb_l_ref = jnp.take(letter_table, input_l.reshape(N, L), axis=0)
    T = L - kernel_size + 1
    w_kdo = jnp.transpose(conv_w, (2, 1, 0))
    conv_ref = sum(
        jnp.einsum("ntd,do->nto", emb_l_ref[:, j:j + T, :], w_kdo[j])
        for j in range(kernel_size)) + conv_b[None, None, :]
    pool_ref = conv_ref.mean(axis=1)
    ref = jnp.concatenate([emb_w_ref, pool_ref], axis=-1).reshape(
        B, S, word_embedding_dim)

    # bf16 table in the main contraction -> relax tolerance vs the f32 reference.
    assert jnp.allclose(out, ref, atol=1e-2, rtol=1e-2), "mismatch vs reference"
    print("KERNEL_OK")
</pallas_src>

<mosaic_0001>
module attributes {stable_mosaic.version = 11 : i64} {
  func.func @_embed_kernel(%arg0: i32, %arg1: memref<8x18xi32, #tpu.memory_space<vmem>>, %arg2: memref<18x768xf32, #tpu.memory_space<vmem>>, %arg3: memref<1x768xf32, #tpu.memory_space<vmem>>, %arg4: memref<768x128xbf16, #tpu.memory_space<vmem>>, %arg5: memref<8x128xf32, #tpu.memory_space<vmem>>) attributes {dimension_semantics = [#tpu.dimension_semantics<parallel>], iteration_bounds = array<i64: 1>, scalar_prefetch = 0 : i64, scratch_operands = 0 : i64, tpu.core_type = #tpu.core_type<tc>, window_params = [{transform_indices = @transform_0, window_bounds = array<i64: 8, 18>}, {pipeline_mode = #tpu.pipeline_mode<synchronous>, transform_indices = @transform_1, window_bounds = array<i64: 18, 768>}, {pipeline_mode = #tpu.pipeline_mode<synchronous>, transform_indices = @transform_2, window_bounds = array<i64: 1, 768>}, {pipeline_mode = #tpu.pipeline_mode<synchronous>, transform_indices = @transform_3, window_bounds = array<i64: 768, 128>}, {transform_indices = @transform_4, window_bounds = array<i64: 8, 128>}]} {
    %c0 = arith.constant 0 : index
    %c0_0 = arith.constant 0 : index
    %0 = vector.load %arg1[%c0, %c0_0] : memref<8x18xi32, #tpu.memory_space<vmem>>, vector<8x18xi32>
    %1 = arith.sitofp %0 : vector<8x18xi32> to vector<8x18xf32>
    %c0_1 = arith.constant 0 : index
    %c0_2 = arith.constant 0 : index
    %2 = vector.load %arg2[%c0_1, %c0_2] : memref<18x768xf32, #tpu.memory_space<vmem>>, vector<18x768xf32>
    %cst = arith.constant dense<0.000000e+00> : vector<8x768xf32>
    %3 = tpu.matmul %1, %2, %cst {dimension_numbers = #tpu.dot_dimension_numbers<[1], [0], [0], [1], [0, 0, 1, 1], [], []>} : vector<8x18xf32>, vector<18x768xf32>, vector<8x768xf32> -> vector<8x768xf32>
    %c0_3 = arith.constant 0 : index
    %c0_4 = arith.constant 0 : index
    %4 = vector.load %arg3[%c0_3, %c0_4] : memref<1x768xf32, #tpu.memory_space<vmem>>, vector<1x768xf32>
    %5 = vector.broadcast %4 : vector<1x768xf32> to vector<8x768xf32>
    %6 = arith.cmpf oeq, %3, %5 : vector<8x768xf32>
    %7 = arith.extui %6 : vector<8x768xi1> to vector<8x768xi32>
    %8 = arith.sitofp %7 : vector<8x768xi32> to vector<8x768xf32>
    %9 = arith.truncf %8 : vector<8x768xf32> to vector<8x768xbf16>
    %c0_5 = arith.constant 0 : index
    %c0_6 = arith.constant 0 : index
    %10 = vector.load %arg4[%c0_5, %c0_6] : memref<768x128xbf16, #tpu.memory_space<vmem>>, vector<768x128xbf16>
    %cst_7 = arith.constant dense<0.000000e+00> : vector<8x128xf32>
    %11 = tpu.matmul %9, %10, %cst_7 {dimension_numbers = #tpu.dot_dimension_numbers<[1], [0], [0], [1], [0, 0, 1, 1], [], []>} : vector<8x768xbf16>, vector<768x128xbf16>, vector<8x128xf32> -> vector<8x128xf32>
    %c0_8 = arith.constant 0 : index
    %c0_9 = arith.constant 0 : index
    %12 = vector.load %arg5[%c0_8, %c0_9] : memref<8x128xf32, #tpu.memory_space<vmem>>, vector<8x128xf32>
    tpu.vector_store %arg5[%c0_8, %c0_9], %11 {strides = array<i32>} : memref<8x128xf32, #tpu.memory_space<vmem>>, vector<8x128xf32>,
    return
  }
  func.func @transform_0(%arg0: i32) -> (i32, i32) {
    %c0_i32 = arith.constant 0 : i32
    %c0_i32_0 = arith.constant 0 : i32
    return %arg0, %c0_i32 : i32, i32
  }
  func.func @transform_1(%arg0: i32) -> (i32, i32) {
    %c0_i32 = arith.constant 0 : i32
    %c0_i32_0 = arith.constant 0 : i32
    %c0_i32_1 = arith.constant 0 : i32
    return %c0_i32, %c0_i32_0 : i32, i32
  }
  func.func @transform_2(%arg0: i32) -> (i32, i32) {
    %c0_i32 = arith.constant 0 : i32
    %c0_i32_0 = arith.constant 0 : i32
    %c0_i32_1 = arith.constant 0 : i32
    return %c0_i32, %c0_i32_0 : i32, i32
  }
  func.func @transform_3(%arg0: i32) -> (i32, i32) {
    %c0_i32 = arith.constant 0 : i32
    %c0_i32_0 = arith.constant 0 : i32
    %c0_i32_1 = arith.constant 0 : i32
    return %c0_i32, %c0_i32_0 : i32, i32
  }
  func.func @transform_4(%arg0: i32) -> (i32, i32) {
    %c0_i32 = arith.constant 0 : i32
    %c0_i32_0 = arith.constant 0 : i32
    return %arg0, %c0_i32 : i32, i32
  }
}

</mosaic_0001>

<bundles_post_ra>
// kernel: embedding_forward.1
= control target key start
LH: loop header
LB: loop body
LE: loop exit
PB: predicated region body
PF: predicated region fallthrough
CT: control target
= control target key end

     0   :  { %9 = vsyncpa [#allocation3], 0  ;;  %s1167_s0 = inlined_call_operand.vmem [shape: s32[8,18], index: 0, kind: input, shape index: {}]   ;;  %s1168_s1 = inlined_call_operand.hbm [shape: f32[18,768], index: 1, kind: input, shape index: {}]   ;;  %s1169_s2 = inlined_call_operand.vmem [shape: f32[1,768], index: 2, kind: input, shape index: {}]   ;;  %s1170_s3 = inlined_call_operand.hbm [shape: bf16[768,128], index: 3, kind: input, shape index: {}]   ;;  %s1171_s4 = inlined_call_operand.vmem [shape: f32[8,128], index: 4, kind: output, shape index: {}]  }
   0x1   :  { %10 = vsyncpa [#allocation5], 0  ;;  %s1110_s15 = smov [#allocation2]  }
   0x2   :  { %s18_s16 = sshll.u32 %s1110_s15, 4  ;;  %s19_s16 = int_to_ptr.vmem [resolvable:$true] %s18_s16 }
   0x3   :  { %s1074_s17 = scalar_lea.vmem %s19_s16, 2304  ;;  %p1079_p1 = scmp.lt.s32.totalorder %s19_s16, %s19_s16 }
   0x4   :  { %p1075_p0 = scmp.ne.s32.totalorder %s19_s16, %s1074_s17  ;;  %p1080_p2 = scmp.lt.s32.totalorder %s1074_s17, %s1074_s17 }
   0x6   :  { %p1081_p3 = por %p1080_p2, %p1079_p1 }
   0x8   :  { %p1082_p4 = pnand %p1081_p3, %p1075_p0 }
   0xa   :  { %1085 = shalt.err (!%p1082_p4)
}
   0xb   :  { %s1111_s18 = smov 768   ;;  %s1112_s19 = smov 48  }
   0xc   :  { %24 = dma.hbm_to_vmem [thread:$0]  %s1168_s1, 2304, %s19_s16, [#allocation3], %s1111_s18, %s1111_s18, %s1112_s19  }
   0xd   :  { %s1113_s22 = smov [#allocation4]  }
   0xe   :  { %s32_s23 = sshll.u32 %s1113_s22, 4  ;;  %s33_s23 = int_to_ptr.vmem [resolvable:$true] %s32_s23 }
   0xf   :  { %s1094_s24 = scalar_lea.vmem %s33_s23, 6144  ;;  %p1099_p6 = scmp.lt.s32.totalorder %s33_s23, %s33_s23 }
  0x10   :  { %p1095_p5 = scmp.ne.s32.totalorder %s33_s23, %s1094_s24  ;;  %p1100_p7 = scmp.lt.s32.totalorder %s1094_s24, %s1094_s24 }
  0x12   :  { %p1101_p8 = por %p1100_p7, %p1099_p6 }
  0x14   :  { %p1102_p9 = pnand %p1101_p8, %p1095_p5 }
  0x16   :  { %1105 = shalt.err (!%p1102_p9)
}
  0x17   :  { %s1114_s25 = smov 64   ;;  %s1115_s26 = smov 4  }
  0x18   :  { %38 = dma.hbm_to_vmem [thread:$0]  %s1170_s3, 6144, %s33_s23, [#allocation5], %s1114_s25, %s1114_s25, %s1115_s26  }
  0x19   :  { %1106 = dma.done.wait [#allocation3], 2304  }
  0x1a   :  { %1107 = vsyncadd [#allocation3], 4294964992 }
  0x1b   :  { %1108 = dma.done.wait [#allocation5], 6144  }
  0x1c   :  { %1109 = vsyncadd [#allocation5], 4294961152  ;;  %v1116_v0 = vmov 0.0   ;;  %vm70_vm0 = vcmask 1041408   ;;  %v61_v1 = vld [vmem:[#allocation2 + $0x68] sm:$0x3]  ;;  %v304_v54 = vlaneseq }
  0x1d   :  { %153 = vmatprep.mubr.f32.mxu0 %v1116_v0  ;;  %v60_v2 = vld [vmem:[#allocation2 + $0x60] sm:$0x3]  ;;  %v55_v3 = vld [vmem:[#allocation2 + $0x38] sm:$0xff]  ;;  %869 = vmatprep.subr.msk.mxu0 %vm70_vm0, %v61_v1  ;;  %v54_v4 = vld [vmem:[#allocation2 + $0x30] sm:$0xff]  ;;  %vm66_vm1 = vcmask 146432  }
  0x1e   :  { %870 = vmatpush1.msk.msra.mxu0 %vm70_vm0, %v60_v2  ;;  %v49_v5 = vld [vmem:[#allocation2 + $0x8] sm:$0xff]  ;;  %v46_v6 = vld [vmem:[%s1167_s0] sm:$0xff]  ;;  %v63_v9 = vld [vmem:[#allocation2 + $0x78] sm:$0x3]  ;;  %v305_v55 = vshrl.u32 %v304_v54, 7 }
  0x1f   :  { %117 = vmatprep.subr.mxu0 %v55_v3  ;;  %v48_v7 = vld [vmem:[#allocation2] sm:$0xff]  ;;  %v47_v8 = vcvt.s32.f32 %v46_v6  ;;  %v62_v10 = vld [vmem:[#allocation2 + $0x70] sm:$0x3]  ;;  %v57_v11 = vld [vmem:[#allocation2 + $0x48] sm:$0xff] }
  0x20   :  { %118 = vmatpush1.msra.mxu0 %v54_v4  ;;  %v56_v12 = vld [vmem:[#allocation2 + $0x40] sm:$0xff]  ;;  %v51_v13 = vld [vmem:[#allocation2 + $0x18] sm:$0xff]  ;;  %v50_v14 = vld [vmem:[#allocation2 + $0x10] sm:$0xff]  ;;  %v306_v56 = vsub.s32 0, %v305_v55  ;;  %v310_v58 = vsub.s32 1, %v305_v55  ;;  %v314_v61 = vsub.s32 2, %v305_v55 }
  0x21   :  { %119 = vmatprep.subr.mxu0 %v49_v5  ;;  %v1018_v15 = vld [vmem:[#allocation4 + $0x78] sm:$0xff]   ;;  %v64_v18 = vld [vmem:[#allocation2 + $0x80] sm:$0x3]  ;;  %v59_v20 = vld [vmem:[#allocation2 + $0x58] sm:$0xff]  ;;  %v318_v63 = vsub.s32 3, %v305_v55 }
  0x22   :  { %120 = vmatpush1.msra.mxu0 %v48_v7  ;;  %v65_v16 = vld [vmem:[#allocation2 + $0x88] sm:$0x3]  ;;  %944 = vmatprep.subr.bf16.mxu1 %v1018_v15  ;;  %v1020_v19 = vld [vmem:[#allocation4 + $0x70] sm:$0xff]   ;;  %v58_v21 = vld [vmem:[#allocation2 + $0x50] sm:$0xff]  ;;  %v1117_v4 = vmov 1.0|1.0  }
  0x23   :  { %871 = vmatmul.mubr.msk.f32.vlgmr.msra.gmra.mxu0 %vm66_vm1, %v47_v8  ;;  %872 = vmatprep.subr.msk.mxu0 %vm70_vm0, %v63_v9  ;;  %v1019_v17 = vld [vmem:[#allocation4 + $0x38] sm:$0xff]   ;;  %v1021_v22 = vld [vmem:[#allocation4 + $0x30] sm:$0xff]   ;;  %v1023_v24 = vld [vmem:[#allocation4 + $0x68] sm:$0xff]  }
  0x24   :  { %873 = vmatpush1.msk.msra.mxu0 %vm70_vm0, %v62_v10  ;;  %224 = vmatprep.mubr.f32.mxu0 %v1116_v0  ;;  %v53_v23 = vld [vmem:[#allocation2 + $0x28] sm:$0xff]  ;;  %v52_v25 = vld [vmem:[#allocation2 + $0x20] sm:$0xff]  ;;  %v1025_v28 = vld [vmem:[#allocation4 + $0x28] sm:$0xff]  }
  0x25   :  { %188 = vmatprep.subr.mxu0 %v57_v11  ;;  %945 = vmatpush3.bf16.msra.mxu1 %v1019_v17  ;;  %v1022_v26 = vld [vmem:[#allocation4 + $0xf8] sm:$0xff]   ;;  %v1026_v29 = vld [vmem:[#allocation4 + $0xf0] sm:$0xff]   ;;  %v1027_v30 = vld [vmem:[#allocation4 + $0x60] sm:$0xff]  }
  0x26   :  { %189 = vmatpush1.msra.mxu0 %v56_v12  ;;  %946 = vmatprep.subr.bf16.mxu1 %v1020_v19  ;;  %v1024_v27 = vld [vmem:[#allocation4 + $0xb8] sm:$0xff]   ;;  %v1028_v31 = vld [vmem:[#allocation4 + $0xb0] sm:$0xff]   ;;  %v1029_v32 = vld [vmem:[#allocation4 + $0x20] sm:$0xff]  }
  0x27   :  { %190 = vmatprep.subr.mxu0 %v51_v13  ;;  %v1030_v33 = vld [vmem:[#allocation4 + $0xe8] sm:$0xff]   ;;  %v1031_v34 = vld [vmem:[#allocation4 + $0x58] sm:$0xff]   ;;  %v1034_v37 = vld [vmem:[#allocation4 + $0xe0] sm:$0xff]  }
  0x28   :  { %191 = vmatpush1.msra.mxu0 %v50_v14  ;;  %v1032_v35 = vld [vmem:[#allocation4 + $0xa8] sm:$0xff]   ;;  %v1033_v36 = vld [vmem:[#allocation4 + $0x18] sm:$0xff]   ;;  %v1035_v38 = vld [vmem:[#allocation4 + $0x50] sm:$0xff]  }
  0x29   :  { %874 = vmatmul.mubr.msk.f32.vlgmr.msra.gmra.mxu0 %vm66_vm1, %v47_v8  ;;  %875 = vmatprep.subr.msk.mxu0 %vm70_vm0, %v65_v16  ;;  %v1036_v39 = vld [vmem:[#allocation4 + $0xa0] sm:$0xff]   ;;  %v1037_v40 = vld [vmem:[#allocation4 + $0x10] sm:$0xff]   ;;  %v1038_v41 = vld [vmem:[#allocation4 + $0xd8] sm:$0xff]  }
  0x2a   :  { %876 = vmatpush1.msk.msra.mxu0 %vm70_vm0, %v64_v18  ;;  %295 = vmatprep.mubr.f32.mxu0 %v1116_v0  ;;  %v1039_v42 = vld [vmem:[#allocation4 + $0x48] sm:$0xff]   ;;  %v1040_v43 = vld [vmem:[#allocation4 + $0x98] sm:$0xff]   ;;  %v1042_v45 = vld [vmem:[#allocation4 + $0xd0] sm:$0xff]  }
  0x2b   :  { %259 = vmatprep.subr.mxu0 %v59_v20  ;;  %947 = vmatpush3.bf16.msra.mxu1 %v1021_v22  ;;  %v1041_v44 = vld [vmem:[#allocation4 + $0x8] sm:$0xff]   ;;  %v1043_v46 = vld [vmem:[#allocation4 + $0x40] sm:$0xff]   ;;  %v1044_v47 = vld [vmem:[#allocation4 + $0x90] sm:$0xff]   ;;  %v322_v22 = vsub.s32 4, %v305_v55 }
  0x2c   :  { %260 = vmatpush1.msra.mxu0 %v58_v21  ;;  %948 = vmatprep.subr.bf16.mxu1 %v1023_v24  ;;  %v1045_v48 = vld [vmem:[#allocation4] sm:$0xff]   ;;  %v1046_v49 = vld [vmem:[#allocation4 + $0xc8] sm:$0xff]   ;;  %v1048_v51 = vld [vmem:[#allocation4 + $0x178] sm:$0xff]  }
  0x2d   :  { %261 = vmatprep.subr.mxu0 %v53_v23  ;;  %v1047_v50 = vld [vmem:[#allocation4 + $0x88] sm:$0xff]   ;;  %v1050_v52 = vld [vmem:[#allocation4 + $0xc0] sm:$0xff]   ;;  %v302_v57 = vld [vmem:[%s1169_s2] sm:$0x3f] }
  0x2e   :  { %262 = vmatpush1.msra.mxu0 %v52_v25  ;;  %v1051_v53 = vld [vmem:[#allocation4 + $0x80] sm:$0xff]   ;;  %v307_v59 = vrot.slane %v302_v57, %v306_v56  ;;  %v311_v60 = vrot.slane %v302_v57, %v310_v58  ;;  %v315_v1 = vrot.slane %v302_v57, %v314_v61  ;;  %v1049_v2 = vld [vmem:[#allocation4 + $0x138] sm:$0xff]   ;;  %v1052_v3 = vld [vmem:[#allocation4 + $0x170] sm:$0xff]   ;;  %v319_v5 = vrot.slane %v302_v57, %v318_v63 }
  0x2f   :  { %877 = vmatmul.mubr.msk.f32.vlgmr.msra.gmra.mxu0 %vm66_vm1, %v47_v8  ;;  %966 = vmatprep.subr.bf16.mxu0 %v1022_v26  ;;  %v1053_v7 = vld [vmem:[#allocation4 + $0x130] sm:$0xff]   ;;  %v326_v8 = vsub.s32 5, %v305_v55  ;;  %v1054_v10 = vld [vmem:[#allocation4 + $0x168] sm:$0xff]   ;;  %v1056_v13 = vld [vmem:[#allocation4 + $0x160] sm:$0xff]   ;;  %v323_v25 = vrot.slane %v302_v57, %v322_v22 }
  0x30   :  { %967 = vmatpush3.bf16.msra.mxu0 %v1024_v27  ;;  %949 = vmatpush3.bf16.msra.mxu1 %v1025_v28  ;;  %v1055_v11 = vld [vmem:[#allocation4 + $0x128] sm:$0xff]   ;;  %v1057_v16 = vld [vmem:[#allocation4 + $0x120] sm:$0xff]   ;;  %v1058_v17 = vld [vmem:[#allocation4 + $0x158] sm:$0xff]  }
  0x31   :  { %968 = vmatprep.subr.bf16.mxu0 %v1026_v29  ;;  %950 = vmatprep.subr.bf16.mxu1 %v1027_v30  ;;  %v327_v12 = vrot.slane %v302_v57, %v326_v8  ;;  %v1059_v18 = vld [vmem:[#allocation4 + $0x118] sm:$0xff]   ;;  %v1060_v19 = vld [vmem:[#allocation4 + $0x150] sm:$0xff]   ;;  %v1062_v21 = vld [vmem:[#allocation4 + $0x148] sm:$0xff]  }
  0x32   :  { %v1061_v20 = vld [vmem:[#allocation4 + $0x110] sm:$0xff]   ;;  %v1063_v23 = vld [vmem:[#allocation4 + $0x108] sm:$0xff]   ;;  %v1064_v24 = vld [vmem:[#allocation4 + $0x140] sm:$0xff]  }
  0x33   :  { %v1065_v26 = vld [vmem:[#allocation4 + $0x100] sm:$0xff]  }
  0x34   :  { %969 = vmatpush3.bf16.msra.mxu0 %v1028_v31  ;;  %951 = vmatpush3.bf16.msra.mxu1 %v1029_v32 }
  0x35   :  { %970 = vmatprep.subr.bf16.mxu0 %v1030_v33  ;;  %952 = vmatprep.subr.bf16.mxu1 %v1031_v34 }
  0x38   :  { %971 = vmatpush3.bf16.msra.mxu0 %v1032_v35  ;;  %953 = vmatpush3.bf16.msra.mxu1 %v1033_v36 }
  0x39   :  { %972 = vmatprep.subr.bf16.mxu0 %v1034_v37  ;;  %954 = vmatprep.subr.bf16.mxu1 %v1035_v38 }
  0x3c   :  { %973 = vmatpush3.bf16.msra.mxu0 %v1036_v39  ;;  %955 = vmatpush3.bf16.msra.mxu1 %v1037_v40 }
  0x3d   :  { %974 = vmatprep.subr.bf16.mxu0 %v1038_v41  ;;  %956 = vmatprep.subr.bf16.mxu1 %v1039_v42 }
  0x40   :  { %975 = vmatpush3.bf16.msra.mxu0 %v1040_v43  ;;  %957 = vmatpush3.bf16.msra.mxu1 %v1041_v44 }
  0x41   :  { %976 = vmatprep.subr.bf16.mxu0 %v1042_v45  ;;  %958 = vmatprep.subr.bf16.mxu1 %v1043_v46 }
  0x44   :  { %977 = vmatpush3.bf16.msra.mxu0 %v1044_v47  ;;  %959 = vmatpush3.bf16.msra.mxu1 %v1045_v48 }
  0x45   :  { %978 = vmatprep.subr.bf16.mxu0 %v1046_v49  ;;  %988 = vmatprep.subr.bf16.mxu1 %v1048_v51 }
  0x48   :  { %979 = vmatpush3.bf16.msra.mxu0 %v1047_v50 }
  0x49   :  { %980 = vmatprep.subr.bf16.mxu0 %v1050_v52 }
  0x4c   :  { %981 = vmatpush3.bf16.msra.mxu0 %v1051_v53 }
  0xe3   :  { %v155_v62 = vpop.f32.mrf.mxu0 }
  0xe4   :  { %vm334_vm2 = vcmp.eq.f32.partialorder %v155_v62, %v307_v59 }
  0xe5   :  { %v157_v0 = vpop.f32.mrf.mxu0  ;;  %vm934_vm5 = vmpackc.low %vm334_vm2, %vm334_vm2 }
  0xe6   :  { %vm335_vm3 = vcmp.eq.f32.partialorder %v157_v0, %v311_v60 }
  0xe7   :  { %vm932_vm4 = vmpackc.low %vm335_vm3, %vm335_vm3 }
  0xe8   :  { %933 = vmatprep.mubr.msk.bf16.mxu1 %vm932_vm4, %v1117_v4 }
  0xe9   :  { %v226_v6 = vpop.f32.mrf.mxu0  ;;  %935 = vmatmul.mubr.msk.bf16.vlgmr.msra.gmra.mxu1 %vm934_vm5, %v1117_v4 }
  0xea   :  { %vm336_vm6 = vcmp.eq.f32.partialorder %v226_v6, %v315_v1  ;;  %989 = vmatpush3.bf16.msra.mxu1 %v1049_v2 }
  0xeb   :  { %v228_v9 = vpop.f32.mrf.mxu0  ;;  %990 = vmatprep.subr.bf16.mxu1 %v1052_v3  ;;  %vm938_vm7 = vmpackc.low %vm336_vm6, %vm336_vm6 }
  0xec   :  { %vm337_vm8 = vcmp.eq.f32.partialorder %v228_v9, %v319_v5 }
  0xed   :  { %vm936_vm9 = vmpackc.low %vm337_vm8, %vm337_vm8 }
  0xee   :  { %991 = vmatpush3.bf16.msra.mxu1 %v1053_v7  ;;  %937 = vmatprep.mubr.msk.bf16.mxu0 %vm936_vm9, %v1117_v4 }
  0xef   :  { %939 = vmatmul.mubr.msk.bf16.vlgmr.msra.gmra.mxu0 %vm938_vm7, %v1117_v4  ;;  %992 = vmatprep.subr.bf16.mxu1 %v1054_v10  ;;  %v297_v14 = vpop.f32.mrf.mxu0 }
  0xf0   :  { %vm338_vm12 = vcmp.eq.f32.partialorder %v297_v14, %v323_v25 }
  0xf1   :  { %v299_v15 = vpop.f32.mrf.mxu0  ;;  %vm942_vm13 = vmpackc.low %vm338_vm12, %vm338_vm12 }
  0xf2   :  { %993 = vmatpush3.bf16.msra.mxu1 %v1055_v11  ;;  %vm339_vm10 = vcmp.eq.f32.partialorder %v299_v15, %v327_v12 }
  0xf3   :  { %994 = vmatprep.subr.bf16.mxu1 %v1056_v13  ;;  %vm940_vm11 = vmpackc.low %vm339_vm10, %vm339_vm10 }
  0xf4   :  { %941 = vmatprep.mubr.msk.bf16.mxu1 %vm940_vm11, %v1117_v4 }
  0xf6   :  { %995 = vmatpush3.bf16.msra.mxu1 %v1057_v16 }
  0xf7   :  { %996 = vmatprep.subr.bf16.mxu1 %v1058_v17 }
  0xfa   :  { %997 = vmatpush3.bf16.msra.mxu1 %v1059_v18 }
  0xfb   :  { %998 = vmatprep.subr.bf16.mxu1 %v1060_v19 }
  0xfe   :  { %999 = vmatpush3.bf16.msra.mxu1 %v1061_v20 }
  0xff   :  { %1000 = vmatprep.subr.bf16.mxu1 %v1062_v21 }
 0x102   :  { %1001 = vmatpush3.bf16.msra.mxu1 %v1063_v23 }
 0x103   :  { %1002 = vmatprep.subr.bf16.mxu1 %v1064_v24 }
 0x106   :  { %1003 = vmatpush3.bf16.msra.mxu1 %v1065_v26 }
 0x109   :  { %943 = vmatmul.mubr.msk.bf16.vlgmr.msra.gmra.mxu1 %vm942_vm13, %v1117_v4 }
 0x1a9   :  { %v960_v27 = vpop.f32.mrf.mxu1 }
 0x1ab   :  { %v961_v28 = vpop.f32.mrf.mxu1 }
 0x1ac   :  { %v962_v37 = vadd.f32 %v961_v28, %v960_v27 }
 0x1ad   :  { %v963_v29 = vpop.f32.mrf.mxu1 }
 0x1af   :  { %v964_v30 = vpop.f32.mrf.mxu1  ;;  %v982_v31 = vpop.f32.mrf.mxu0 }
 0x1b1   :  { %v983_v32 = vpop.f32.mrf.mxu0 }
 0x1b2   :  { %v984_v35 = vadd.f32 %v983_v32, %v982_v31 }
 0x1b3   :  { %v985_v33 = vpop.f32.mrf.mxu0 }
 0x1b4   :  { %v817_v39 = vadd.f32 %v984_v35, %v962_v37 }
 0x1b5   :  { %v986_v34 = vpop.f32.mrf.mxu0 }
 0x1c9   :  { %v1004_v36 = vpop.f32.mrf.mxu1 }
 0x1cb   :  { %v1005_v38 = vpop.f32.mrf.mxu1 }
 0x1cc   :  { %v1006_v40 = vadd.f32 %v1005_v38, %v1004_v36 }
 0x1cd   :  { %v1007_v41 = vpop.f32.mrf.mxu1 }
 0x1ce   :  { %v857_v42 = vadd.f32 %v1006_v40, %v817_v39 }
 0x1cf   :  { %v1008_v43 = vpop.f32.mrf.mxu1 }
 0x1d0   :  { %862 = vst [vmem:[%s1171_s4] sm:$0xff] %v857_v42 }
 0x1d1   :  { %867 = vsyncpa [#allocation3], 1 }
 0x1d2   :  { %868 = vsyncpa [#allocation5], 1 }

</bundles_post_ra>
